<compile_context>
chip_gen: v7x
topology: tpu7x:2x2x1
jax: 0.10.0
libtpu: 0.0.40
codegen_flags: <defaults>
</compile_context>

<pallas_src>
import math
from functools import partial

import jax
import jax.numpy as jnp
from jax.experimental import pallas as pl
from jax.experimental.pallas import tpu as pltpu


def bernnet_kernel(avals_ref,                       # (K+1,) SMEM: comb(K,m)/2^K * relu(temp[m])
                   x_ref,                           # (F, TN)  node features, transposed block
                   w1_ref, b1_ref,                  # (H, F), (H, 1)   lin1 (PyTorch layout)
                   w2_ref, b2_ref,                  # (C, H), (C, 1)   lin2
                   lap_ref,                         # (TN, TN) bf16 block of L (rows=contraction)
                   logp_ref, feat_ref,              # (C, TN) lane-dense output blocks
                   cur_ref, acc_ref,                # (2*J, C, TN) f32 ping-pong Horner state
                   *, K, J, C, TN):
    k = pl.program_id(0)   # 0: init (lin1/relu/lin2); 1..K: Horner propagation steps
    j = pl.program_id(1)   # output node-column block of the (C, N) state
    i = pl.program_id(2)   # contraction block over rows of L

    # ---------------- phase 0: z = lin2(relu(lin1(x))) in (C, TN) layout ----------------
    @pl.when(jnp.logical_and(k == 0, i == 0))
    def _init():
        h = jnp.dot(w1_ref[...], x_ref[...],
                    preferred_element_type=jnp.float32) + b1_ref[...]
        h = jnp.maximum(h, 0.0)                                   # ReLU(lin1(x))
        z = jnp.dot(w2_ref[...], h,
                    preferred_element_type=jnp.float32) + b2_ref[...]
        cur_ref[j] = z                      # slot 0 holds (2I-L)^0 z
        acc_ref[j] = avals_ref[K] * z       # Horner seed: a_K * z

    # ------------- phases 1..K: cur <- 2*cur - cur@L ; acc <- a_{K-k}*cur + acc@L -------------
    @pl.when(k > 0)
    def _step():
        rd = ((k + 1) % 2) * J              # slot with state after step k-1
        wr = (k % 2) * J                    # slot being built for step k
        l_blk = lap_ref[...].astype(jnp.float32)   # bf16-stored tile, f32 compute/accumulate

        @pl.when(i == 0)
        def _():
            cur_ref[wr + j] = 2.0 * cur_ref[rd + j]
            acc_ref[wr + j] = jnp.zeros((C, TN), jnp.float32)

        # transposed-layout propagation (L symmetric): (v @ L)[:, j-block], contraction block i
        cur_ref[wr + j] = cur_ref[wr + j] - jnp.dot(
            cur_ref[rd + i], l_blk, preferred_element_type=jnp.float32)
        acc_ref[wr + j] = acc_ref[wr + j] + jnp.dot(
            acc_ref[rd + i], l_blk, preferred_element_type=jnp.float32)

        @pl.when(i == J - 1)
        def _():
            acc_ref[wr + j] = acc_ref[wr + j] + avals_ref[K - k] * cur_ref[wr + j]

    # ---------------- final step: log_softmax over classes, lane-dense writeback ----------------
    @pl.when(jnp.logical_and(k == K, i == J - 1))
    def _finish():
        out = acc_ref[(K % 2) * J + j]                    # (C, TN), f32
        m = jnp.max(out, axis=0, keepdims=True)           # reduce over classes (sublanes)
        lse = m + jnp.log(jnp.sum(jnp.exp(out - m), axis=0, keepdims=True))
        feat_ref[...] = out
        logp_ref[...] = out - lse


def bernnet_forward(x, w1, b1, w2, b2, lap, temp, K, *, tile_n=512):
    """BernNet forward.

    x   : (N, F) node features
    w1  : (H, F) lin1.weight (PyTorch layout), b1: (H,)
    w2  : (C, H) lin2.weight,                  b2: (C,)
    lap : (N, N) symmetric sym-normalized Laplacian  L = I - D^-1/2 A D^-1/2
    temp: (K+1,) Bern_prop coefficients
    Returns (log_softmax(feat), feat) with shapes (N, C).
    """
    N, F_in = x.shape
    H = w1.shape[0]
    C = w2.shape[0]

    TN = N if N <= tile_n else tile_n
    assert N % TN == 0, "N must be divisible by the node tile size"
    J = N // TN

    # Fold binomial coefficient and relu(temp) into one small SMEM vector.
    coefs = jnp.asarray([math.comb(K, m) / (2.0 ** K) for m in range(K + 1)], jnp.float32)
    avals = coefs * jnp.maximum(temp.astype(jnp.float32), 0.0)

    # Feature-major layout: node dim on the lane axis; L stored bf16 (f32 accumulate).
    x_t = x.T.astype(jnp.float32)                 # (F, N)
    b1c = b1.reshape(H, 1).astype(jnp.float32)
    b2c = b2.reshape(C, 1).astype(jnp.float32)
    lap_bf = lap.astype(jnp.bfloat16)

    grid = (K + 1, J, J)

    smem = pl.BlockSpec(memory_space=pltpu.MemorySpace.SMEM)
    in_specs = [
        smem,                                                    # avals (K+1,)
        pl.BlockSpec((F_in, TN), lambda k, j, i: (0, j)),        # x_t
        pl.BlockSpec((H, F_in),  lambda k, j, i: (0, 0)),        # w1
        pl.BlockSpec((H, 1),     lambda k, j, i: (0, 0)),        # b1
        pl.BlockSpec((C, H),     lambda k, j, i: (0, 0)),        # w2
        pl.BlockSpec((C, 1),     lambda k, j, i: (0, 0)),        # b2
        pl.BlockSpec((TN, TN),   lambda k, j, i: (i, j)),        # lap (bf16)
    ]
    out_specs = (
        pl.BlockSpec((C, TN), lambda k, j, i: (0, j)),           # logp (transposed)
        pl.BlockSpec((C, TN), lambda k, j, i: (0, j)),           # feat (transposed)
    )
    scratch_shapes = [
        pltpu.VMEM((2 * J, C, TN), jnp.float32),                 # cur (ping-pong over steps)
        pltpu.VMEM((2 * J, C, TN), jnp.float32),                 # acc
    ]

    cost = pl.CostEstimate(
        flops=int(4 * K * C * N * N + 2 * N * F_in * H + 2 * N * H * C),
        transcendentals=int(N * C),
        bytes_accessed=int((K + 1) * N * N * 2 + (N * F_in + 2 * N * C) * 4),
    )

    kernel = partial(bernnet_kernel, K=K, J=J, C=C, TN=TN)

    logp_t, feat_t = pl.pallas_call(
        kernel,
        out_shape=(jax.ShapeDtypeStruct((C, N), jnp.float32),
                   jax.ShapeDtypeStruct((C, N), jnp.float32)),
        grid=grid,
        in_specs=in_specs,
        out_specs=out_specs,
        scratch_shapes=scratch_shapes,
        compiler_params=pltpu.CompilerParams(
            # every Horner step consumes the full previous state -> no megacore split
            dimension_semantics=("arbitrary", "arbitrary", "arbitrary"),
            vmem_limit_bytes=32 * 1024 * 1024,
        ),
        cost_estimate=cost,
    )(avals, x_t, w1.astype(jnp.float32), b1c, w2.astype(jnp.float32), b2c, lap_bf)

    # back to the module's (N, C) convention (wrapper-side layout plumbing only)
    return logp_t.T, feat_t.T


def bernnet_reference(x, w1, b1, w2, b2, lap, temp, K):
    """Pure-JAX f32 reference mirroring the PyTorch forward."""
    h = jnp.maximum(x @ w1.T + b1, 0.0)
    z = h @ w2.T + b2
    p2 = 2.0 * jnp.eye(x.shape[0], dtype=jnp.float32) - lap
    tmp = [z]
    cur = z
    for _ in range(K):
        cur = p2 @ cur
        tmp.append(cur)
    tr = jnp.maximum(temp, 0.0)
    out = (math.comb(K, 0) / 2 ** K) * tr[0] * tmp[K]
    for i in range(K):
        v = tmp[K - i - 1]
        for _ in range(i + 1):
            v = lap @ v
        out = out + (math.comb(K, i + 1) / 2 ** K) * tr[i + 1] * v
    return jax.nn.log_softmax(out, axis=1), out


if __name__ == "__main__":
    # small shapes consistent with the module:
    # N nodes, num_features=8, hidden=32, num_classes=4, K=3
    N, F_in, H, C, K = 16, 8, 32, 4, 3

    key = jax.random.PRNGKey(0)
    kx, ka, k1, kb1, k2, kb2 = jax.random.split(key, 6)

    x = jax.random.normal(kx, (N, F_in), dtype=jnp.float32)

    # deterministic random undirected graph (no self loops) -> dense adjacency
    a = (jax.random.uniform(ka, (N, N)) < 0.3).astype(jnp.float32)
    a = jnp.triu(a, 1)
    A = a + a.T

    deg = A.sum(axis=1)
    dinv = jnp.where(deg > 0, 1.0 / jnp.sqrt(deg), 0.0)
    A_norm = dinv[:, None] * A * dinv[None, :]
    I = jnp.eye(N, dtype=jnp.float32)
    lap = I - A_norm                      # get_laplacian(normalization='sym'), symmetric

    # deterministic parameter init (synthetic, not a checkpoint load), PyTorch weight layout
    w1 = (jax.random.normal(k1, (H, F_in)) / jnp.sqrt(F_in)).astype(jnp.float32)   # lin1.weight
    b1 = (0.1 * jax.random.normal(kb1, (H,))).astype(jnp.float32)                  # lin1.bias
    w2 = (jax.random.normal(k2, (C, H)) / jnp.sqrt(H)).astype(jnp.float32)         # lin2.weight
    b2 = (0.1 * jax.random.normal(kb2, (C,))).astype(jnp.float32)                  # lin2.bias
    temp = jnp.ones((K + 1,), dtype=jnp.float32)   # Bern_prop.reset_parameters(): fill_(1)

    logp, feat = bernnet_forward(x, w1, b1, w2, b2, lap, temp, K)
    jax.block_until_ready((logp, feat))

    logp_ref, feat_ref = bernnet_reference(x, w1, b1, w2, b2, lap, temp, K)
    # tolerance accounts for bf16 storage of the Laplacian (accumulation stays f32)
    assert jnp.allclose(feat, feat_ref, atol=5e-2, rtol=5e-2), "feature mismatch"
    assert jnp.allclose(logp, logp_ref, atol=5e-2, rtol=5e-2), "log_softmax mismatch"

    print("KERNEL_OK")
</pallas_src>

<mosaic_0001>
module attributes {stable_mosaic.version = 11 : i64} {
  func.func @bernnet_kernel(%arg0: i32, %arg1: i32, %arg2: i32, %arg3: memref<4xf32, #tpu.memory_space<smem>>, %arg4: memref<8x16xf32, #tpu.memory_space<vmem>>, %arg5: memref<32x8xf32, #tpu.memory_space<vmem>>, %arg6: memref<32x1xf32, #tpu.memory_space<vmem>>, %arg7: memref<4x32xf32, #tpu.memory_space<vmem>>, %arg8: memref<4x1xf32, #tpu.memory_space<vmem>>, %arg9: memref<16x16xbf16, #tpu.memory_space<vmem>>, %arg10: memref<4x16xf32, #tpu.memory_space<vmem>>, %arg11: memref<4x16xf32, #tpu.memory_space<vmem>>, %arg12: memref<2x4x16xf32, #tpu.memory_space<vmem>>, %arg13: memref<2x4x16xf32, #tpu.memory_space<vmem>>) attributes {dimension_semantics = [#tpu.dimension_semantics<arbitrary>, #tpu.dimension_semantics<arbitrary>, #tpu.dimension_semantics<arbitrary>], iteration_bounds = array<i64: 4, 1, 1>, scalar_prefetch = 0 : i64, scratch_operands = 2 : i64, tpu.core_type = #tpu.core_type<tc>, window_params = [{transform_indices = @transform_0, window_bounds = array<i64: 4>}, {transform_indices = @transform_1, window_bounds = array<i64: 8, 16>}, {pipeline_mode = #tpu.pipeline_mode<synchronous>, transform_indices = @transform_2, window_bounds = array<i64: 32, 8>}, {pipeline_mode = #tpu.pipeline_mode<synchronous>, transform_indices = @transform_3, window_bounds = array<i64: 32, 1>}, {pipeline_mode = #tpu.pipeline_mode<synchronous>, transform_indices = @transform_4, window_bounds = array<i64: 4, 32>}, {pipeline_mode = #tpu.pipeline_mode<synchronous>, transform_indices = @transform_5, window_bounds = array<i64: 4, 1>}, {transform_indices = @transform_6, window_bounds = array<i64: 16, 16>}, {transform_indices = @transform_7, window_bounds = array<i64: 4, 16>}, {transform_indices = @transform_8, window_bounds = array<i64: 4, 16>}]} {
    %c0_i32 = arith.constant 0 : i32
    %0 = arith.cmpi eq, %arg0, %c0_i32 : i32
    %c0_i32_0 = arith.constant 0 : i32
    %1 = arith.cmpi eq, %arg2, %c0_i32_0 : i32
    %2 = arith.andi %0, %1 : i1
    %3 = arith.extui %2 : i1 to i32
    %c0_i32_1 = arith.constant 0 : i32
    %4 = arith.cmpi ne, %3, %c0_i32_1 : i32
    scf.if %4 {
      %c0 = arith.constant 0 : index
      %c0_6 = arith.constant 0 : index
      %13 = vector.load %arg5[%c0, %c0_6] : memref<32x8xf32, #tpu.memory_space<vmem>>, vector<32x8xf32>
      %c0_7 = arith.constant 0 : index
      %c0_8 = arith.constant 0 : index
      %14 = vector.load %arg4[%c0_7, %c0_8] : memref<8x16xf32, #tpu.memory_space<vmem>>, vector<8x16xf32>
      %cst = arith.constant dense<0.000000e+00> : vector<32x16xf32>
      %15 = tpu.matmul %13, %14, %cst {dimension_numbers = #tpu.dot_dimension_numbers<[1], [0], [0], [1], [0, 0, 1, 1], [], []>} : vector<32x8xf32>, vector<8x16xf32>, vector<32x16xf32> -> vector<32x16xf32>
      %c0_9 = arith.constant 0 : index
      %c0_10 = arith.constant 0 : index
      %16 = vector.load %arg6[%c0_9, %c0_10] : memref<32x1xf32, #tpu.memory_space<vmem>>, vector<32x1xf32>
      %17 = vector.broadcast %16 : vector<32x1xf32> to vector<32x16xf32>
      %18 = arith.addf %15, %17 : vector<32x16xf32>
      %cst_11 = arith.constant 0.000000e+00 : f32
      %19 = vector.broadcast %cst_11 : f32 to vector<32x16xf32>
      %20 = arith.maximumf %18, %19 : vector<32x16xf32>
      %c0_12 = arith.constant 0 : index
      %c0_13 = arith.constant 0 : index
      %21 = vector.load %arg7[%c0_12, %c0_13] : memref<4x32xf32, #tpu.memory_space<vmem>>, vector<4x32xf32>
      %cst_14 = arith.constant dense<0.000000e+00> : vector<4x16xf32>
      %22 = tpu.matmul %21, %20, %cst_14 {dimension_numbers = #tpu.dot_dimension_numbers<[1], [0], [0], [1], [0, 0, 1, 1], [], []>} : vector<4x32xf32>, vector<32x16xf32>, vector<4x16xf32> -> vector<4x16xf32>
      %c0_15 = arith.constant 0 : index
      %c0_16 = arith.constant 0 : index
      %23 = vector.load %arg8[%c0_15, %c0_16] : memref<4x1xf32, #tpu.memory_space<vmem>>, vector<4x1xf32>
      %24 = vector.broadcast %23 : vector<4x1xf32> to vector<4x16xf32>
      %25 = arith.addf %22, %24 : vector<4x16xf32>
      %26 = arith.index_cast %arg1 : i32 to index
      %c0_17 = arith.constant 0 : index
      %c0_18 = arith.constant 0 : index
      %27 = vector.load %arg12[%26, %c0_17, %c0_18] : memref<2x4x16xf32, #tpu.memory_space<vmem>>, vector<1x4x16xf32>
      %28 = vector.shape_cast %27 : vector<1x4x16xf32> to vector<4x16xf32>
      %29 = vector.shape_cast %25 : vector<4x16xf32> to vector<1x4x16xf32>
      tpu.vector_store %arg12[%26, %c0_17, %c0_18], %29 {strides = array<i32>} : memref<2x4x16xf32, #tpu.memory_space<vmem>>, vector<1x4x16xf32>,
      %c3 = arith.constant 3 : index
      %30 = memref.load %arg3[%c3] : memref<4xf32, #tpu.memory_space<smem>>
      %31 = vector.broadcast %30 : f32 to vector<4x16xf32>
      %32 = arith.mulf %31, %25 : vector<4x16xf32>
      %33 = arith.index_cast %arg1 : i32 to index
      %c0_19 = arith.constant 0 : index
      %c0_20 = arith.constant 0 : index
      %34 = vector.load %arg13[%33, %c0_19, %c0_20] : memref<2x4x16xf32, #tpu.memory_space<vmem>>, vector<1x4x16xf32>
      %35 = vector.shape_cast %34 : vector<1x4x16xf32> to vector<4x16xf32>
      %36 = vector.shape_cast %32 : vector<4x16xf32> to vector<1x4x16xf32>
      tpu.vector_store %arg13[%33, %c0_19, %c0_20], %36 {strides = array<i32>} : memref<2x4x16xf32, #tpu.memory_space<vmem>>, vector<1x4x16xf32>,
    } else {
    }
    %c0_i32_2 = arith.constant 0 : i32
    %5 = arith.cmpi sgt, %arg0, %c0_i32_2 : i32
    %6 = arith.extui %5 : i1 to i32
    %c0_i32_3 = arith.constant 0 : i32
    %7 = arith.cmpi ne, %6, %c0_i32_3 : i32
    scf.if %7 {
      %c1_i32 = arith.constant 1 : i32
      %13 = arith.addi %arg0, %c1_i32 : i32
      %c2_i32 = arith.constant 2 : i32
      %c0_i32_6 = arith.constant 0 : i32
      %14 = arith.cmpi eq, %c2_i32, %c0_i32_6 : i32
      %c1_i32_7 = arith.constant 1 : i32
      %15 = arith.select %14, %c1_i32_7, %c2_i32 : i32
      %16 = arith.remsi %13, %15 : i32
      %c0_i32_8 = arith.constant 0 : i32
      %17 = arith.cmpi ne, %16, %c0_i32_8 : i32
      %c0_i32_9 = arith.constant 0 : i32
      %18 = arith.cmpi slt, %16, %c0_i32_9 : i32
      %c0_i32_10 = arith.constant 0 : i32
      %19 = arith.cmpi slt, %15, %c0_i32_10 : i32
      %20 = arith.xori %18, %19 : i1
      %21 = arith.andi %20, %17 : i1
      %22 = arith.addi %16, %15 : i32
      %23 = arith.select %21, %22, %16 : i32
      %c1_i32_11 = arith.constant 1 : i32
      %24 = arith.muli %23, %c1_i32_11 : i32
      %c2_i32_12 = arith.constant 2 : i32
      %c0_i32_13 = arith.constant 0 : i32
      %25 = arith.cmpi eq, %c2_i32_12, %c0_i32_13 : i32
      %c1_i32_14 = arith.constant 1 : i32
      %26 = arith.select %25, %c1_i32_14, %c2_i32_12 : i32
      %27 = arith.remsi %arg0, %26 : i32
      %c0_i32_15 = arith.constant 0 : i32
      %28 = arith.cmpi ne, %27, %c0_i32_15 : i32
      %c0_i32_16 = arith.constant 0 : i32
      %29 = arith.cmpi slt, %27, %c0_i32_16 : i32
      %c0_i32_17 = arith.constant 0 : i32
      %30 = arith.cmpi slt, %26, %c0_i32_17 : i32
      %31 = arith.xori %29, %30 : i1
      %32 = arith.andi %31, %28 : i1
      %33 = arith.addi %27, %26 : i32
      %34 = arith.select %32, %33, %27 : i32
      %c1_i32_18 = arith.constant 1 : i32
      %35 = arith.muli %34, %c1_i32_18 : i32
      %c0 = arith.constant 0 : index
      %c0_19 = arith.constant 0 : index
      %36 = vector.load %arg9[%c0, %c0_19] : memref<16x16xbf16, #tpu.memory_space<vmem>>, vector<16x16xbf16>
      %37 = arith.extf %36 : vector<16x16xbf16> to vector<16x16xf32>
      %c0_i32_20 = arith.constant 0 : i32
      %38 = arith.cmpi eq, %arg2, %c0_i32_20 : i32
      %39 = arith.extui %38 : i1 to i32
      %c0_i32_21 = arith.constant 0 : i32
      %40 = arith.cmpi ne, %39, %c0_i32_21 : i32
      scf.if %40 {
        %74 = arith.addi %24, %arg1 : i32
        %75 = arith.index_cast %74 : i32 to index
        %c0_37 = arith.constant 0 : index
        %c0_38 = arith.constant 0 : index
        %76 = vector.load %arg12[%75, %c0_37, %c0_38] : memref<2x4x16xf32, #tpu.memory_space<vmem>>, vector<1x4x16xf32>
        %77 = vector.shape_cast %76 : vector<1x4x16xf32> to vector<4x16xf32>
        %cst_39 = arith.constant 2.000000e+00 : f32
        %78 = vector.broadcast %cst_39 : f32 to vector<4x16xf32>
        %79 = arith.mulf %78, %77 : vector<4x16xf32>
        %80 = arith.addi %35, %arg1 : i32
        %81 = arith.index_cast %80 : i32 to index
        %c0_40 = arith.constant 0 : index
        %c0_41 = arith.constant 0 : index
        %82 = vector.load %arg12[%81, %c0_40, %c0_41] : memref<2x4x16xf32, #tpu.memory_space<vmem>>, vector<1x4x16xf32>
        %83 = vector.shape_cast %82 : vector<1x4x16xf32> to vector<4x16xf32>
        %84 = vector.shape_cast %79 : vector<4x16xf32> to vector<1x4x16xf32>
        tpu.vector_store %arg12[%81, %c0_40, %c0_41], %84 {strides = array<i32>} : memref<2x4x16xf32, #tpu.memory_space<vmem>>, vector<1x4x16xf32>,
        %cst_42 = arith.constant 0.000000e+00 : f32
        %85 = vector.broadcast %cst_42 : f32 to vector<4x16xf32>
        %86 = arith.addi %35, %arg1 : i32
        %87 = arith.index_cast %86 : i32 to index
        %c0_43 = arith.constant 0 : index
        %c0_44 = arith.constant 0 : index
        %88 = vector.load %arg13[%87, %c0_43, %c0_44] : memref<2x4x16xf32, #tpu.memory_space<vmem>>, vector<1x4x16xf32>
        %89 = vector.shape_cast %88 : vector<1x4x16xf32> to vector<4x16xf32>
        %90 = vector.shape_cast %85 : vector<4x16xf32> to vector<1x4x16xf32>
        tpu.vector_store %arg13[%87, %c0_43, %c0_44], %90 {strides = array<i32>} : memref<2x4x16xf32, #tpu.memory_space<vmem>>, vector<1x4x16xf32>,
      } else {
      }
      %41 = arith.addi %35, %arg1 : i32
      %42 = arith.index_cast %41 : i32 to index
      %c0_22 = arith.constant 0 : index
      %c0_23 = arith.constant 0 : index
      %43 = vector.load %arg12[%42, %c0_22, %c0_23] : memref<2x4x16xf32, #tpu.memory_space<vmem>>, vector<1x4x16xf32>
      %44 = vector.shape_cast %43 : vector<1x4x16xf32> to vector<4x16xf32>
      %45 = arith.addi %24, %arg2 : i32
      %46 = arith.index_cast %45 : i32 to index
      %c0_24 = arith.constant 0 : index
      %c0_25 = arith.constant 0 : index
      %47 = vector.load %arg12[%46, %c0_24, %c0_25] : memref<2x4x16xf32, #tpu.memory_space<vmem>>, vector<1x4x16xf32>
      %48 = vector.shape_cast %47 : vector<1x4x16xf32> to vector<4x16xf32>
      %cst = arith.constant dense<0.000000e+00> : vector<4x16xf32>
      %49 = tpu.matmul %48, %37, %cst {dimension_numbers = #tpu.dot_dimension_numbers<[1], [0], [0], [1], [0, 0, 1, 1], [], []>} : vector<4x16xf32>, vector<16x16xf32>, vector<4x16xf32> -> vector<4x16xf32>
      %50 = arith.subf %44, %49 : vector<4x16xf32>
      %51 = arith.addi %35, %arg1 : i32
      %52 = arith.index_cast %51 : i32 to index
      %c0_26 = arith.constant 0 : index
      %c0_27 = arith.constant 0 : index
      %53 = vector.load %arg12[%52, %c0_26, %c0_27] : memref<2x4x16xf32, #tpu.memory_space<vmem>>, vector<1x4x16xf32>
      %54 = vector.shape_cast %53 : vector<1x4x16xf32> to vector<4x16xf32>
      %55 = vector.shape_cast %50 : vector<4x16xf32> to vector<1x4x16xf32>
      tpu.vector_store %arg12[%52, %c0_26, %c0_27], %55 {strides = array<i32>} : memref<2x4x16xf32, #tpu.memory_space<vmem>>, vector<1x4x16xf32>,
      %56 = arith.addi %35, %arg1 : i32
      %57 = arith.index_cast %56 : i32 to index
      %c0_28 = arith.constant 0 : index
      %c0_29 = arith.constant 0 : index
      %58 = vector.load %arg13[%57, %c0_28, %c0_29] : memref<2x4x16xf32, #tpu.memory_space<vmem>>, vector<1x4x16xf32>
      %59 = vector.shape_cast %58 : vector<1x4x16xf32> to vector<4x16xf32>
      %60 = arith.addi %24, %arg2 : i32
      %61 = arith.index_cast %60 : i32 to index
      %c0_30 = arith.constant 0 : index
      %c0_31 = arith.constant 0 : index
      %62 = vector.load %arg13[%61, %c0_30, %c0_31] : memref<2x4x16xf32, #tpu.memory_space<vmem>>, vector<1x4x16xf32>
      %63 = vector.shape_cast %62 : vector<1x4x16xf32> to vector<4x16xf32>
      %cst_32 = arith.constant dense<0.000000e+00> : vector<4x16xf32>
      %64 = tpu.matmul %63, %37, %cst_32 {dimension_numbers = #tpu.dot_dimension_numbers<[1], [0], [0], [1], [0, 0, 1, 1], [], []>} : vector<4x16xf32>, vector<16x16xf32>, vector<4x16xf32> -> vector<4x16xf32>
      %65 = arith.addf %59, %64 : vector<4x16xf32>
      %66 = arith.addi %35, %arg1 : i32
      %67 = arith.index_cast %66 : i32 to index
      %c0_33 = arith.constant 0 : index
      %c0_34 = arith.constant 0 : index
      %68 = vector.load %arg13[%67, %c0_33, %c0_34] : memref<2x4x16xf32, #tpu.memory_space<vmem>>, vector<1x4x16xf32>
      %69 = vector.shape_cast %68 : vector<1x4x16xf32> to vector<4x16xf32>
      %70 = vector.shape_cast %65 : vector<4x16xf32> to vector<1x4x16xf32>
      tpu.vector_store %arg13[%67, %c0_33, %c0_34], %70 {strides = array<i32>} : memref<2x4x16xf32, #tpu.memory_space<vmem>>, vector<1x4x16xf32>,
      %c0_i32_35 = arith.constant 0 : i32
      %71 = arith.cmpi eq, %arg2, %c0_i32_35 : i32
      %72 = arith.extui %71 : i1 to i32
      %c0_i32_36 = arith.constant 0 : i32
      %73 = arith.cmpi ne, %72, %c0_i32_36 : i32
      scf.if %73 {
        %74 = arith.addi %35, %arg1 : i32
        %75 = arith.index_cast %74 : i32 to index
        %c0_37 = arith.constant 0 : index
        %c0_38 = arith.constant 0 : index
        %76 = vector.load %arg13[%75, %c0_37, %c0_38] : memref<2x4x16xf32, #tpu.memory_space<vmem>>, vector<1x4x16xf32>
        %77 = vector.shape_cast %76 : vector<1x4x16xf32> to vector<4x16xf32>
        %c3_i32_39 = arith.constant 3 : i32
        %78 = arith.subi %c3_i32_39, %arg0 : i32
        %79 = arith.index_cast %78 : i32 to index
        %80 = memref.load %arg3[%79] : memref<4xf32, #tpu.memory_space<smem>>
        %81 = arith.addi %35, %arg1 : i32
        %82 = arith.index_cast %81 : i32 to index
        %c0_40 = arith.constant 0 : index
        %c0_41 = arith.constant 0 : index
        %83 = vector.load %arg12[%82, %c0_40, %c0_41] : memref<2x4x16xf32, #tpu.memory_space<vmem>>, vector<1x4x16xf32>
        %84 = vector.shape_cast %83 : vector<1x4x16xf32> to vector<4x16xf32>
        %85 = vector.broadcast %80 : f32 to vector<4x16xf32>
        %86 = arith.mulf %85, %84 : vector<4x16xf32>
        %87 = arith.addf %77, %86 : vector<4x16xf32>
        %88 = arith.addi %35, %arg1 : i32
        %89 = arith.index_cast %88 : i32 to index
        %c0_42 = arith.constant 0 : index
        %c0_43 = arith.constant 0 : index
        %90 = vector.load %arg13[%89, %c0_42, %c0_43] : memref<2x4x16xf32, #tpu.memory_space<vmem>>, vector<1x4x16xf32>
        %91 = vector.shape_cast %90 : vector<1x4x16xf32> to vector<4x16xf32>
        %92 = vector.shape_cast %87 : vector<4x16xf32> to vector<1x4x16xf32>
        tpu.vector_store %arg13[%89, %c0_42, %c0_43], %92 {strides = array<i32>} : memref<2x4x16xf32, #tpu.memory_space<vmem>>, vector<1x4x16xf32>,
      } else {
      }
    } else {
    }
    %c3_i32 = arith.constant 3 : i32
    %8 = arith.cmpi eq, %arg0, %c3_i32 : i32
    %c0_i32_4 = arith.constant 0 : i32
    %9 = arith.cmpi eq, %arg2, %c0_i32_4 : i32
    %10 = arith.andi %8, %9 : i1
    %11 = arith.extui %10 : i1 to i32
    %c0_i32_5 = arith.constant 0 : i32
    %12 = arith.cmpi ne, %11, %c0_i32_5 : i32
    scf.if %12 {
      %c1_i32 = arith.constant 1 : i32
      %13 = arith.addi %c1_i32, %arg1 : i32
      %14 = arith.index_cast %13 : i32 to index
      %c0 = arith.constant 0 : index
      %c0_6 = arith.constant 0 : index
      %15 = vector.load %arg13[%14, %c0, %c0_6] : memref<2x4x16xf32, #tpu.memory_space<vmem>>, vector<1x4x16xf32>
      %16 = vector.shape_cast %15 : vector<1x4x16xf32> to vector<4x16xf32>
      %cst = arith.constant dense<0xFF800000> : vector<16xf32>
      %17 = vector.multi_reduction <maximumf>, %16, %cst [0] : vector<4x16xf32> to vector<16xf32>
      %18 = vector.shape_cast %17 : vector<16xf32> to vector<1x16xf32>
      %19 = vector.broadcast %18 : vector<1x16xf32> to vector<4x16xf32>
      %20 = arith.subf %16, %19 : vector<4x16xf32>
      %21 = math.exp %20 : vector<4x16xf32>
      %cst_7 = arith.constant dense<0.000000e+00> : vector<16xf32>
      %22 = vector.multi_reduction <add>, %21, %cst_7 [0] : vector<4x16xf32> to vector<16xf32>
      %23 = vector.shape_cast %22 : vector<16xf32> to vector<1x16xf32>
      %24 = math.log %23 : vector<1x16xf32>
      %25 = arith.addf %18, %24 : vector<1x16xf32>
      %c0_8 = arith.constant 0 : index
      %c0_9 = arith.constant 0 : index
      %26 = vector.load %arg11[%c0_8, %c0_9] : memref<4x16xf32, #tpu.memory_space<vmem>>, vector<4x16xf32>
      tpu.vector_store %arg11[%c0_8, %c0_9], %16 {strides = array<i32>} : memref<4x16xf32, #tpu.memory_space<vmem>>, vector<4x16xf32>,
      %27 = vector.broadcast %25 : vector<1x16xf32> to vector<4x16xf32>
      %28 = arith.subf %16, %27 : vector<4x16xf32>
      %c0_10 = arith.constant 0 : index
      %c0_11 = arith.constant 0 : index
      %29 = vector.load %arg10[%c0_10, %c0_11] : memref<4x16xf32, #tpu.memory_space<vmem>>, vector<4x16xf32>
      tpu.vector_store %arg10[%c0_10, %c0_11], %28 {strides = array<i32>} : memref<4x16xf32, #tpu.memory_space<vmem>>, vector<4x16xf32>,
    } else {
    }
    return
  }
  func.func @transform_0(%arg0: i32, %arg1: i32, %arg2: i32) -> i32 {
    %c0_i32 = arith.constant 0 : i32
    %c0_i32_0 = arith.constant 0 : i32
    return %c0_i32 : i32
  }
  func.func @transform_1(%arg0: i32, %arg1: i32, %arg2: i32) -> (i32, i32) {
    %c0_i32 = arith.constant 0 : i32
    %c0_i32_0 = arith.constant 0 : i32
    return %c0_i32, %arg1 : i32, i32
  }
  func.func @transform_2(%arg0: i32, %arg1: i32, %arg2: i32) -> (i32, i32) {
    %c0_i32 = arith.constant 0 : i32
    %c0_i32_0 = arith.constant 0 : i32
    %c0_i32_1 = arith.constant 0 : i32
    return %c0_i32, %c0_i32_0 : i32, i32
  }
  func.func @transform_3(%arg0: i32, %arg1: i32, %arg2: i32) -> (i32, i32) {
    %c0_i32 = arith.constant 0 : i32
    %c0_i32_0 = arith.constant 0 : i32
    %c0_i32_1 = arith.constant 0 : i32
    return %c0_i32, %c0_i32_0 : i32, i32
  }
  func.func @transform_4(%arg0: i32, %arg1: i32, %arg2: i32) -> (i32, i32) {
    %c0_i32 = arith.constant 0 : i32
    %c0_i32_0 = arith.constant 0 : i32
    %c0_i32_1 = arith.constant 0 : i32
    return %c0_i32, %c0_i32_0 : i32, i32
  }
  func.func @transform_5(%arg0: i32, %arg1: i32, %arg2: i32) -> (i32, i32) {
    %c0_i32 = arith.constant 0 : i32
    %c0_i32_0 = arith.constant 0 : i32
    %c0_i32_1 = arith.constant 0 : i32
    return %c0_i32, %c0_i32_0 : i32, i32
  }
  func.func @transform_6(%arg0: i32, %arg1: i32, %arg2: i32) -> (i32, i32) {
    %c0_i32 = arith.constant 0 : i32
    return %arg2, %arg1 : i32, i32
  }
  func.func @transform_7(%arg0: i32, %arg1: i32, %arg2: i32) -> (i32, i32) {
    %c0_i32 = arith.constant 0 : i32
    %c0_i32_0 = arith.constant 0 : i32
    return %c0_i32, %arg1 : i32, i32
  }
  func.func @transform_8(%arg0: i32, %arg1: i32, %arg2: i32) -> (i32, i32) {
    %c0_i32 = arith.constant 0 : i32
    %c0_i32_0 = arith.constant 0 : i32
    return %c0_i32, %arg1 : i32, i32
  }
}

</mosaic_0001>

<bundles_post_ra>
// kernel: tpu_custom_call.1
= control target key start
LH: loop header
LB: loop body
LE: loop exit
PB: predicated region body
PF: predicated region fallthrough
CT: control target
= control target key end

     0   :  { %14 = vsyncpa [#allocation6], 0  ;;  %s1494_s0 = inlined_call_operand.vmem [shape: f32[4], index: 0, kind: input, shape index: {}]   ;;  %s1495_s1 = inlined_call_operand.vmem [shape: f32[8,16], index: 1, kind: input, shape index: {}]   ;;  %s1496_s2 = inlined_call_operand.vmem [shape: f32[32,8], index: 2, kind: input, shape index: {}]   ;;  %s1497_s3 = inlined_call_operand.vmem [shape: f32[32,1], index: 3, kind: input, shape index: {}]   ;;  %s1498_s4 = inlined_call_operand.vmem [shape: f32[4,32], index: 4, kind: input, shape index: {}]   ;;  %s1499_s5 = inlined_call_operand.vmem [shape: f32[4,1], index: 5, kind: input, shape index: {}]   ;;  %s1500_s6 = inlined_call_operand.vmem [shape: bf16[16,16], index: 6, kind: input, shape index: {}]   ;;  %s1501_s7 = inlined_call_operand.hbm [shape: f32[4,16], index: 7, kind: output, shape index: {0}]   ;;  %s1502_s8 = inlined_call_operand.hbm [shape: f32[4,16], index: 8, kind: output, shape index: {1}]  }
   0x1   :  { %15 = vsyncpa [#allocation5], 0 }
   0x2   :  { %16 = vsyncpa [#allocation9], 0  ;;  %s1318_s27 = smov 0   ;;  %s1320_s28 = smov 0  }
   0x3   :  { %s1322_s29 = smov 0  }
   0x4 LB: > { %s996_s30 = sadd.s32 4294967295, %s1261_s29   ;;  %s41_s9 = sadd.s32 1, %s1257_s28  ;;  %s1261_s29 = sphi %s1322_s29, %s22_s29   ;;  %s1257_s28 = sphi %s1320_s28, %s1507_s28   ;;  %s1253_s27 = sphi %s1318_s27, %s1506_s27  }
   0x5   : > { %p43_p0 = scmp.ge.s32.totalorder %s41_s9, 4  ;;  %p997_p1 = scmp.ge.s32.totalorder %s1261_s29, 1 }
   0x6   : > { %p257_p2 = scmp.lt.s32.totalorder %s1261_s29, 5  ;;  %p1345_p4 = scmp.eq.s32.totalorder %s996_s30, 0 }
   0x7   : > { %s1509_s9 = smov (%p43_p0, %s41_s9), 0  ;;  %s270_s14 = sshll.u32 %s1494_s0, 4  ;;  %s271_s14 = int_to_ptr.vmem [resolvable:$true] %s270_s14 }
   0x8   : > { %p1339_p3 = pnand %p997_p1, %p257_p2  ;;  %s1160_s15 = scalar_lea.vmem %s271_s14, 16 }
   0x9   : > { %p1161_p7 = scmp.ne.s32.totalorder %s271_s14, %s1160_s15  ;;  %p1168_p11 = scmp.lt.s32.totalorder %s271_s14, %s271_s14 }
   0xa   : > { %p1110_p5 = pneg %p1339_p3  ;;  %p1169_p12 = scmp.lt.s32.totalorder %s1160_s15, %s1160_s15 }
   0xc   : > { %p1111_p6 = pnand %p1345_p4, %p1110_p5  ;;  %p1170_p13 = por %p1169_p12, %p1168_p11 }
   0xe   : > { %p1162_p8 = pneg %p1111_p6 }
  0x10   : > { %p1163_p9 = pnand %p1162_p8, %p1161_p7 }
  0x12   : > { %p1164_p10 = pneg %p1163_p9 }
  0x14   : > { %p1171_p0 = pnand %p1170_p13, %p1164_p10 }
  0x16   : > { %1174 = shalt.err (!%p1171_p0)
}
  0x17   : > { %s1263_s16 = smov [#allocation4]   ;;  %314 = sbr.rel (%p1339_p3) target bundleno = 848 (0x350), region = 48 }
  0x18   : > { %1113 = dma.vmem_to_smem (!%p1111_p6), %s271_s14, 16, %s1263_s16, [#allocation6]  }
  0x1e   : > { %1240 = dma.done.wait (%p1345_p4), [#allocation6], 16  }
  0x1f   : > { %1242 = vsyncadd (%p1345_p4), [#allocation6], 4294967280 }
  0x20   : > { %320 = sfence }
  0x21   : > { %p364_p1 = scmp.eq.s32.totalorder %s1253_s27, 0 }
  0x22   : > { %v374_v0 = vld [vmem:[%s1495_s1] sm:$0xff] (%p364_p1)  ;;  %vm399_vm0 = vcmask (%p364_p1), 64512   ;;  %v371_v2 = vld [vmem:[%s1496_s2 + $0x8] sm:$0xff] (%p364_p1)  ;;  %v372_v3 = vld [vmem:[%s1496_s2 + $0x10] sm:$0xff] (%p364_p1)  ;;  %v1264_v5 = vmov (%p364_p1), 0   ;;  %v1265_v11 = vmov (%p364_p1), 0.0|0.0  }
  0x23   : > { %369 = sbr.rel (!%p364_p1) target bundleno = 480 (0x1e0), region = 56  ;;  %v370_v1 = vld [vmem:[%s1496_s2] sm:$0xff] (%p364_p1)  ;;  %1053 = vmatprep.subr.mxu0 (%p364_p1), %v374_v0  ;;  %1154 = vset.pattern.permute.xlu0 (%p364_p1), %v1264_v5  ;;  %v377_v6 = vld [vmem:[%s1497_s3 + $0x10] sm:$0xff] (%p364_p1)  ;;  %v373_v7 = vld [vmem:[%s1496_s2 + $0x18] sm:$0xff] (%p364_p1)  ;;  %vm1266_vm1 = vmmov (%p364_p1), 0   ;;  %v1267_v12 = vmov (%p364_p1), 0.0  }
  0x24   : > { %1055 = vmatprep.mubr.msk.f32.mxu0 (%p364_p1), %vm399_vm0, %v370_v1  ;;  %v375_v4 = vld [vmem:[%s1497_s3] sm:$0xff] (%p364_p1)  ;;  %1054 = vmatpush3.msra.mxu0 (%p364_p1), %v374_v0  ;;  %v376_v8 = vld [vmem:[%s1497_s3 + $0x8] sm:$0xff] (%p364_p1)  ;;  %v378_v9 = vld [vmem:[%s1497_s3 + $0x18] sm:$0xff] (%p364_p1)  ;;  %vm508_vm2 = vcmask (%p364_p1), 261120   ;;  %s1009_s22 = sld [smem:[#allocation4 + $0x3]] (%p364_p1)  ;;  %vm584_vm3 = vcmask (%p364_p1), 125952  }
  0x25   : > { %1056 = vmatmul.mubr.msk.f32.vlgmr.msra.gmra.mrb[0].mxu0 (%p364_p1), %vm399_vm0, %v371_v2  ;;  %381 = vperm.xlu0 (%p364_p1), %1154, %v375_v4   ;;  %v502_v10 = vld [vmem:[%s1499_s5] sm:$0xf] (%p364_p1) }
  0x26   : > { %1058 = vmatprep.mubr.msk.f32.mxu0 (%p364_p1), %vm399_vm0, %v372_v3  ;;  %1155 = vset.pattern.permute.xlu1 (%p364_p1), %v1264_v5  ;;  %v501_v31 = vld [vmem:[%s1498_s4] sm:$0xf] (%p364_p1) }
  0x27   : > { %391 = vperm.xlu1 (%p364_p1), %1155, %v377_v6   ;;  %1086 = vmatprep.subr.bf16.mxu1 (%p364_p1), %v1265_v11 }
  0x28   : > { %1069 = vmatprep.mubr.msk.f32.mxu1 (%p364_p1), %vm1266_vm1, %v1267_v12 }
  0x29   : > { %1059 = vmatmul.mubr.msk.f32.gmra.mrb[2].mxu0 (%p364_p1), %vm399_vm0, %v373_v7  ;;  %386 = vperm.xlu0 (%p364_p1), %1154, %v376_v8  }
  0x2a   : > { %v587_v34 = vstv %s1009_s22 }
  0x2b   : > { %396 = vperm.xlu1 %1155, %v378_v9  }
  0x2d   : > { %505 = vperm.xlu0 %1154, %v502_v10  }
  0xa4   : > { %v382_v13 = vpop.permute.xlu0 %381 }
  0xa6   : > { %v392_v14 = vpop.permute.xlu1 %391 }
  0xa8   : > { %v387_v15 = vpop.permute.xlu0 %386 }
  0xaa   : > { %v397_v21 = vpop.permute.xlu1 %396 }
  0xac   : > { %v506_v32 = vpop.permute.xlu0 %505 }
  0xf8   : > { %v1057_v16 = vpop.f32.mrb[0].mxu0 }
  0xf9   : > { %v484_v17 = vadd.f32 %v1057_v16, %v387_v15  ;;  %v478_v18 = vpop.f32.mrb[1].mxu0 }
  0xfa   : > { %v479_v19 = vadd.f32 %v478_v18, %v382_v13 }
  0xfb   : > { %v498_v20 = vmax.f32 %v484_v17, 0.0 }
  0xfc   : > { %v497_v22 = vmax.f32 %v479_v19, 0.0  ;;  %v1060_v23 = vpop.f32.mrb[2].mxu0 }
  0xfd   : > { %v494_v24 = vadd.f32 %v1060_v23, %v397_v21  ;;  %v488_v25 = vpop.f32.mrb[3].mxu0 }
  0xfe   : > { %v489_v26 = vadd.f32 %v488_v25, %v392_v14  ;;  %v1087_v27 = vpack.c.bf16 %v498_v20, %v497_v22 }
  0xff   : > { %v500_v28 = vmax.f32 %v494_v24, 0.0 }
 0x100   : > { %v499_v29 = vmax.f32 %v489_v26, 0.0  ;;  %1088 = vmatpush3.bf16.msra.mxu1 %v1087_v27 }
 0x101   : > { %1089 = vmatprep.subr.bf16.mxu1 %v1265_v11 }
 0x102   : > { %v1090_v30 = vpack.c.bf16 %v500_v28, %v499_v29 }
 0x104   : > { %1091 = vmatpush3.bf16.msra.mxu1 %v1090_v30 }
 0x107   : > { %1070 = vmatmul.mubr.msk.f32.vlgmr.msra.gmra.mrb[0].mxu1 %vm508_vm2, %v501_v31 }
 0x1da   : > { %v578_v33 = vpop.f32.mrb[0].mxu1 }
 0x1db   : > { %v579_v35 = vadd.f32 %v578_v33, %v506_v32  ;;  %v1071_v36 = vpop.f32.mrb[1].mxu1 }
 0x1dd   : > { %585 = vst.msk [vmem:[#allocation2] sm:$0xf] %vm584_vm3, %v579_v35  ;;  %v588_v37 = vmul.f32 %v587_v34, %v579_v35 }
 0x1df   : > { %590 = vst.msk [vmem:[#allocation3] sm:$0xf] %vm584_vm3, %v588_v37 }
 0x1e0 PF: > { %p1010_p2 = scmp.le.s32.totalorder %s1253_s27, 0 }
 0x1e1   : > { %v1034_v38 = vld [vmem:[%s1500_s6] sm:$0xff] (!%p1010_p2)   ;;  %p608_p3 = scmp.lt.s32.totalorder (!%p1010_p2), %s1253_s27, 0  ;;  %s609_s25 = ssub.s32 (!%p1010_p2), 0, %s1253_s27  ;;  %v1268_v39 = vmov (!%p1010_p2), 0.0|0.0   ;;  %vm1269_vm4 = vmmov (!%p1010_p2), 0   ;;  %v1270_v40 = vmov (!%p1010_p2), 0.0  }
 0x1e2   : > { %594 = sbr.rel (%p1010_p2) target bundleno = 734 (0x2de), region = 60  ;;  %1092 = vmatprep.subr.bf16.mxu0 (!%p1010_p2), %v1268_v39  ;;  %1095 = vmatprep.subr.bf16.mxu1 (!%p1010_p2), %v1268_v39  ;;  %s1014_s26 = smin.u32 (!%p1010_p2), %s1253_s27, %s609_s25  ;;  %vm635_vm5 = vcmask (!%p1010_p2), 125952   ;;  %vm647_vm6 = vcmask (!%p1010_p2), 130048  }
 0x1e3   : > { %s595_s10 = sadd.s32 (!%p1010_p2), 1, %s1253_s27  ;;  %1094 = vmatpush3.bf16.msra.mxu0 (!%p1010_p2), %v1034_v38  ;;  %1097 = vmatpush3.bf16.msra.mxu1 (!%p1010_p2), %v1034_v38  ;;  %s611_s11 = sand.u32 (!%p1010_p2), 1, %s1014_s26  }
 0x1e4   : > { %s612_s12 = ssub.s32 (!%p1010_p2), 0, %s611_s11  ;;  %1076 = vmatprep.mubr.msk.f32.mxu0 (!%p1010_p2), %vm1269_vm4, %v1270_v40  ;;  %s597_s13 = ssub.s32 (!%p1010_p2), 0, %s595_s10  ;;  %1083 = vmatprep.mubr.msk.f32.mxu1 (!%p1010_p2), %vm1269_vm4, %v1270_v40 }
 0x1e5   : > { %s1011_s14 = smin.u32 (!%p1010_p2), %s597_s13, %s595_s10  ;;  %p596_p5 = scmp.lt.s32.totalorder (!%p1010_p2), %s595_s10, 0 }
 0x1e6   : > { %s599_s16 = sand.u32 (!%p1010_p2), 1, %s1011_s14   ;;  %s807_s25 = ssub.s32 (!%p1010_p2), 3, %s1253_s27 }
 0x1e7   : > { %s600_s17 = ssub.s32 (!%p1010_p2), 0, %s599_s16  ;;  %s808_s26 = sld [smem:[#allocation4 + %s807_s25]] (!%p1010_p2) }
 0x1e9   : > { %s1511_s12 = smov (!%p608_p3, %s612_s12), %s611_s11  ;;  %s1515_s17 = smov (!%p596_p5, %s600_s17), %s599_s16 }
 0x1ea   : > { %p1016_p4 = scmp.lt.s32.totalorder %s1511_s12, 0  ;;  %s618_s15 = sadd.s32 2, %s1511_s12 }
 0x1eb   : > { %p1013_p6 = scmp.lt.s32.totalorder %s1515_s17, 0  ;;  %s606_s20 = sadd.s32 2, %s1515_s17 }
 0x1ec   : > { %s1513_s15 = smov (!%p1016_p4, %s618_s15), %s1511_s12 }
 0x1ed   : > { %s1018_s18 = sshll.u32 %s1513_s15, 2  ;;  %s1517_s20 = smov (!%p1013_p6, %s606_s20), %s1515_s17  ;;  %v810_v53 = vstv %s808_s26 }
 0x1ee   : > { %s1410_s19 = scalar_lea.vmem [#allocation3], %s1018_s18  ;;  %s1017_s21 = sshll.u32 %s1517_s20, 2 }
 0x1ef   : > { %638 = vst.msk [vmem:[%s1410_s19] sm:$0xf] %vm635_vm5, %v1270_v40  ;;  %s629_s22 = scalar_lea.vmem [#allocation2], %s1017_s21  ;;  %s726_s23 = scalar_lea.vmem [#allocation3], %s1017_s21 }
 0x1f0   : > { %v630_v41 = vld [vmem:[%s629_s22] sm:$0xf]  ;;  %s634_s24 = scalar_lea.vmem [#allocation2], %s1018_s18 }
 0x1f1   : > { %v631_v43 = vmul.f32 2.0, %v630_v41 }
 0x1f3   : > { %636 = vst.msk [vmem:[%s634_s24] sm:$0xf] %vm635_vm5, %v631_v43 }
 0x1f6   : > { %v727_v42 = vld [vmem:[%s726_s23] sm:$0xf] }
 0x1f7   : > { %1084 = vmatmul.mubr.msk.f32.vlgmr.msra.gmra.mrb[0].mxu1 %vm647_vm6, %v727_v42  ;;  %v725_v45 = vld [vmem:[%s1410_s19] sm:$0xf] }
 0x1fa   : > { %v646_v44 = vld [vmem:[%s629_s22] sm:$0xf] }
 0x1fb   : > { %1077 = vmatmul.mubr.msk.f32.vlgmr.msra.gmra.mrb[0].mxu0 %vm647_vm6, %v646_v44  ;;  %v642_v49 = vld [vmem:[%s634_s24] sm:$0xf] }
 0x2ca   : > { %v797_v46 = vpop.f32.mrb[0].mxu1 }
 0x2cb   : > { %v801_v47 = vadd.f32 %v797_v46, %v725_v45  ;;  %v1085_v48 = vpop.f32.mrb[1].mxu1 }
 0x2cd   : > { %802 = vst.msk [vmem:[%s1410_s19] sm:$0xf] %vm635_vm5, %v801_v47 }
 0x2ce   : > { %v717_v50 = vpop.f32.mrb[0].mxu0 }
 0x2cf   : > { %v721_v51 = vsub.f32 %v642_v49, %v717_v50  ;;  %v1078_v52 = vpop.f32.mrb[1].mxu0 }
 0x2d1   : > { %723 = vst.msk [vmem:[%s634_s24] sm:$0xf] %vm635_vm5, %v721_v51 }
 0x2d4   : > { %v806_v54 = vld [vmem:[%s1410_s19] sm:$0xf] }
 0x2d8   : > { %v809_v55 = vld [vmem:[%s634_s24] sm:$0xf] }
 0x2d9   : > { %v811_v56 = vmul.f32 %v810_v53, %v809_v55 }
 0x2db   : > { %v812_v57 = vadd.f32 %v811_v56, %v806_v54 }
 0x2dd   : > { %813 = vst.msk [vmem:[%s1410_s19] sm:$0xf] %vm635_vm5, %v812_v57 }
 0x2de PF: > { %p814_p7 = scmp.eq.s32.totalorder %s1253_s27, 3 }
 0x2df   : > { %vm823_vm7 = vcmask (%p814_p7), 125952  }
 0x2e0   : > { %818 = sbr.rel (!%p814_p7) target bundleno = 800 (0x320), region = 72 }
 0x2e4   : > { %v1024_v58 = vld [vmem:[#allocation3 + $0x4] sm:$0xf] (%p814_p7) }
 0x2e5   : > { %v824_v59 = vsel (%p814_p7), %vm823_vm7, %v1024_v58, -inf  ;;  %844 = vst.msk [vmem:[#allocation8] sm:$0xf] (%p814_p7), %vm823_vm7, %v1024_v58 }
 0x2e6   : > { %v825_v60 = vrot.slane (%p814_p7), %v824_v59, 4 }
 0x2e8   : > { %v826_v61 = vmax.f32 %v824_v59, %v825_v60 }
 0x2ea   : > { %v827_v62 = vrot.slane %v826_v61, 2 }
 0x2ec   : > { %v828_v63 = vmax.f32 %v826_v61, %v827_v62 }
 0x2ee   : > { %v829_v0 = vrot.slane %v828_v63, 1 }
 0x2f0   : > { %v830_v1 = vmax.f32 %v828_v63, %v829_v0 }
 0x2f2   : > { %v831_v2 = vsub.f32 %v1024_v58, %v830_v1 }
 0x2f4   : > { %v832_v3 = vmul.f32 1.442695, %v831_v2 }
 0x2f6   : > { %1156 = vpow2.f32 %v832_v3 }
 0x300   : > { %v1157_v4 = vpop.eup %1156 }
 0x301   : > { %v834_v5 = vsel %vm823_vm7, %v1157_v4, 0.0 }
 0x302   : > { %v835_v6 = vrot.slane %v834_v5, 4 }
 0x304   : > { %v836_v7 = vadd.f32 %v835_v6, %v834_v5 }
 0x306   : > { %v837_v8 = vrot.slane %v836_v7, 2 }
 0x308   : > { %v838_v9 = vadd.f32 %v837_v8, %v836_v7 }
 0x30a   : > { %v839_v10 = vrot.slane %v838_v9, 1 }
 0x30c   : > { %v840_v11 = vadd.f32 %v839_v10, %v838_v9 }
 0x30e   : > { %1158 = vlog2.f32 %v840_v11 }
 0x318   : > { %v1159_v12 = vpop.eup %1158 }
 0x319   : > { %v842_v13 = vmul.f32 0.6931472, %v1159_v12 }
 0x31b   : > { %v843_v14 = vadd.f32 %v842_v13, %v830_v1 }
 0x31d   : > { %v845_v15 = vsub.f32 %v1024_v58, %v843_v14 }
 0x31f   : > { %846 = vst.msk [vmem:[#allocation7] sm:$0xf] %vm823_vm7, %v845_v15 }
 0x320 PF: > { %p1430_p8 = scmp.eq.s32.totalorder %s996_s30, 3  ;;  %s1271_s10 = smov [#allocation7]  }
 0x321   : > { %s856_s11 = sshll.u32 %s1271_s10, 4  ;;  %s1272_s12 = smov [#allocation8]   ;;  %s857_s11 = int_to_ptr.vmem [resolvable:$true] %s856_s11 }
 0x322   : > { %s869_s13 = sshll.u32 %s1272_s12, 4  ;;  %s1175_s14 = scalar_lea.vmem %s857_s11, 64  ;;  %s1434_s13 = int_to_ptr.vmem [resolvable:$true] %s869_s13 }
 0x323   : > { %p1176_p9 = scmp.ne.s32.totalorder %s857_s11, %s1175_s14  ;;  %p1182_p12 = scmp.lt.s32.totalorder %s857_s11, %s857_s11 }
 0x324   : > { %p1183_p13 = scmp.lt.s32.totalorder %s1175_s14, %s1175_s14 }
 0x325   : > { %p1177_p10 = pnand %p1176_p9, %p1430_p8 }
 0x326   : > { %p1184_p0 = por %p1183_p13, %p1182_p12 }
 0x327   : > { %p1178_p11 = pneg %p1177_p10 }
 0x329   : > { %p1185_p1 = pnand %p1184_p0, %p1178_p11 }
 0x32b   : > { %1188 = shalt.err (!%p1185_p1)
}
 0x32c   : > { %s1189_s16 = scalar_lea.hbm %s1501_s7, 64 }
 0x32d   : > { %p1190_p2 = scmp.ne.s32.totalorder %s1501_s7, %s1189_s16  ;;  %p1195_p5 = scmp.lt.u32.totalorder %s1189_s16, %s1501_s7 }
 0x32f   : > { %p1191_p3 = pnand %p1190_p2, %p1430_p8 }
 0x331   : > { %p1192_p4 = pneg %p1191_p3 }
 0x333   : > { %p1197_p6 = pnand %p1195_p5, %p1192_p4 }
 0x335   : > { %1200 = shalt.err (!%p1197_p6)
}
 0x336   : > { %1103 = dma.vmem_to_hbm [thread:$0]  (%p1430_p8), %s857_s11, 64, %s1501_s7, [#allocation5]  }
 0x337   : > { %s1201_s23 = scalar_lea.vmem %s1434_s13, 64  ;;  %p1208_p11 = scmp.lt.s32.totalorder %s1434_s13, %s1434_s13 }
 0x338   : > { %p1202_p7 = scmp.ne.s32.totalorder %s1434_s13, %s1201_s23  ;;  %p1209_p12 = scmp.lt.s32.totalorder %s1201_s23, %s1201_s23 }
 0x33a   : > { %p1203_p9 = pnand %p1202_p7, %p1430_p8  ;;  %p1210_p13 = por %p1209_p12, %p1208_p11 }
 0x33c   : > { %p1204_p10 = pneg %p1203_p9 }
 0x33e   : > { %p1211_p0 = pnand %p1210_p13, %p1204_p10 }
 0x340   : > { %1214 = shalt.err (!%p1211_p0)
}
 0x341   : > { %s1215_s26 = scalar_lea.hbm %s1502_s8, 64 }
 0x342   : > { %p1216_p1 = scmp.ne.s32.totalorder %s1502_s8, %s1215_s26  ;;  %p1221_p4 = scmp.lt.u32.totalorder %s1215_s26, %s1502_s8 }
 0x344   : > { %p1217_p2 = pnand %p1216_p1, %p1430_p8 }
 0x346   : > { %p1218_p3 = pneg %p1217_p2 }
 0x348   : > { %p1223_p5 = pnand %p1221_p4, %p1218_p3 }
 0x34a   : > { %1226 = shalt.err (!%p1223_p5)
}
 0x34b   : > { %1105 = dma.vmem_to_hbm [thread:$0]  (%p1430_p8), %s1434_s13, 64, %s1502_s8, [#allocation9]  }
 0x34c   : > { %1244 = dma.done.wait (%p1430_p8), [#allocation5], 64  }
 0x34d   : > { %1246 = vsyncadd (%p1430_p8), [#allocation5], 4294967232 }
 0x34e   : > { %1248 = dma.done.wait (%p1430_p8), [#allocation9], 64  }
 0x34f   : > { %1250 = vsyncadd (%p1430_p8), [#allocation9], 4294967232 }
 0x350 PF: > { %s22_s29 = sadd.s32 1, %s1261_s29   ;;  %s1506_s27 = smov %s1257_s28 }
 0x351   : > { %p19_p6 = scmp.ge.s32.totalorder %s22_s29, 6   ;;  %s1507_s28 = smov %s1509_s9 }
 0x353   :  { %21 = sbr.rel (!%p19_p6) target bundleno = 4 (0x4), region = 123 }
 0x35a   :  { %886 = vsyncpa [#allocation5], 1 }
 0x35b   :  { %888 = vsyncpa [#allocation5 + $0x1], 1 }
 0x35c   :  { %889 = vsyncpa [#allocation9], 1 }
 0x35d   :  { %890 = vsyncpa [#allocation6], 1 }
 0x35e   :  { %892 = vsyncpa [#allocation6 + $0x1], 1 }

</bundles_post_ra>
